<compile_context>
chip_gen: v7x
topology: tpu7x:2x2x1
jax: 0.10.0
libtpu: 0.0.40
codegen_flags: <defaults>
</compile_context>

<pallas_src>
import functools

import jax
import jax.numpy as jnp
import numpy as np
from jax.experimental import pallas as pl
from jax.experimental.pallas import tpu as pltpu


# ----------------------------------------------------------------------------
# Kernel 1: direct conv for one (batch, row-tile) block + partial BN stats.
# ----------------------------------------------------------------------------
def _conv_stats_kernel(x_ref, w_ref, y_ref, stats_ref, *, K, TOH, OW):
    # x_ref     : (HP, WP, Cin)    bf16  whole padded image for this batch elem
    # w_ref     : (K*K*Cin, Cpad)  bf16  weights, Cout padded to 128 lanes
    # y_ref     : (TOH*OW, Cpad)   bf16  conv output tile
    # stats_ref : (8, Cpad)        f32   row 0 = sum, row 1 = sum of squares
    m = pl.program_id(1)
    cin = x_ref.shape[-1]
    cpad = stats_ref.shape[-1]

    row0 = pl.multiple_of(m * TOH, TOH)
    slab = x_ref[pl.ds(row0, TOH + K - 1), :, :]          # (TOH+K-1, WP, Cin)

    # Build the (TOH*OW, K*K*Cin) LHS once, then a single MXU matmul with a
    # K*K*Cin-deep contraction (instead of K*K accumulated Cin-deep matmuls).
    windows = []
    for kh in range(K):
        for kw in range(K):
            win = slab[kh:kh + TOH, kw:kw + OW, :]        # (TOH, OW, Cin)
            windows.append(win.reshape(TOH * OW, cin))
    lhs = jnp.concatenate(windows, axis=-1)               # (TOH*OW, K*K*Cin)

    acc = jnp.dot(lhs, w_ref[...], preferred_element_type=jnp.float32)

    y_ref[...] = acc.astype(y_ref.dtype)                  # bf16 intermediate
    ssum = jnp.sum(acc, axis=0, keepdims=True)            # (1, Cpad) f32
    sssq = jnp.sum(acc * acc, axis=0, keepdims=True)
    stats_ref[...] = jnp.concatenate(
        [ssum, sssq, jnp.zeros((6, cpad), jnp.float32)], axis=0)


# ----------------------------------------------------------------------------
# Kernel 2: BatchNorm affine + ReLU on one (batch, row-tile) block.
# ----------------------------------------------------------------------------
def _bn_relu_kernel(y_ref, scale_ref, shift_ref, o_ref):
    # y_ref : (TM, Cpad) bf16, o_ref : (TM, Cout) f32, scale/shift : (1, Cout)
    cout = o_ref.shape[-1]
    y = y_ref[...].astype(jnp.float32)
    z = y[:, :cout] * scale_ref[...] + shift_ref[...]
    o_ref[...] = jnp.maximum(z, 0.0)


def _pick_toh(oh, ow, target_rows):
    """Largest divisor of OH giving an M tile <= target_rows rows."""
    cap = max(1, min(oh, max(1, target_rows // max(ow, 1))))
    toh = oh
    for t in range(cap, 0, -1):
        if oh % t == 0:
            toh = t
            break
    if (toh * ow) % 8 != 0:      # keep M tile sublane-aligned; else whole image
        toh = oh
    return toh


def sim_conv_forward(x_nchw, weight_oihw, gamma, beta, *, stride=1, eps=1e-5,
                     m_tile_rows=512):
    """SimConv.forward (groups=1, bias=False, padding=k//2, BN training mode).

    x_nchw      : (N, Cin, H, W)  float32
    weight_oihw : (Cout, Cin, K, K)
    gamma, beta : (Cout,)
    Returns NCHW float32.
    """
    N, Cin, H, W = x_nchw.shape
    Cout, _, K, _ = weight_oihw.shape
    assert stride == 1, "only stride=1 implemented"
    # TODO(synk): stride > 1 and groups > 1 variants of nn.Conv2d.
    p = K // 2
    OH = H + 2 * p - K + 1
    OW = W + 2 * p - K + 1
    M = N * OH * OW
    LANE = 128
    Cpad = ((Cout + LANE - 1) // LANE) * LANE
    HP, WP = H + 2 * p, W + 2 * p

    TOH = _pick_toh(OH, OW, m_tile_rows)    # output rows per M tile
    MT = OH // TOH                          # number of M tiles
    TM = TOH * OW                           # rows per matmul
    VMEM_LIMIT = 48 * 1024 * 1024

    # ---- glue: NCHW -> NHWC, spatial pad, bf16 cast -------------------------
    x_nhwc = jnp.transpose(x_nchw, (0, 2, 3, 1))
    x_pad = jnp.pad(x_nhwc, ((0, 0), (p, p), (p, p), (0, 0))).astype(jnp.bfloat16)

    # weights (Cout, Cin, K, K) -> (K, K, Cin, Cout) -> (K*K*Cin, Cpad), bf16
    w = jnp.transpose(weight_oihw, (2, 3, 1, 0)).reshape(K * K * Cin, Cout)
    w = jnp.pad(w, ((0, 0), (0, Cpad - Cout))).astype(jnp.bfloat16)

    # ---- Pallas call 1: conv + per-(n, m) batch-stat partials ---------------
    kernel1 = functools.partial(_conv_stats_kernel, K=K, TOH=TOH, OW=OW)
    y_flat, stats = pl.pallas_call(
        kernel1,
        out_shape=(
            jax.ShapeDtypeStruct((N, OH * OW, Cpad), jnp.bfloat16),
            jax.ShapeDtypeStruct((N, MT * 8, Cpad), jnp.float32),
        ),
        grid_spec=pltpu.PrefetchScalarGridSpec(
            num_scalar_prefetch=0,
            grid=(N, MT),
            in_specs=[
                # image block index constant along m -> DMA'd once per batch el
                pl.BlockSpec((None, HP, WP, Cin), lambda n, m: (n, 0, 0, 0)),
                pl.BlockSpec((K * K * Cin, Cpad), lambda n, m: (0, 0)),
            ],
            out_specs=[
                pl.BlockSpec((None, TM, Cpad), lambda n, m: (n, m, 0)),
                pl.BlockSpec((None, 8, Cpad), lambda n, m: (n, m, 0)),
            ],
        ),
        compiler_params=pltpu.CompilerParams(
            dimension_semantics=("parallel", "parallel"),
            vmem_limit_bytes=VMEM_LIMIT),
    )(x_pad, w)

    # ---- glue: reduce partial stats, fold into one affine (scale, shift) ----
    stats = stats.reshape(N, MT, 8, Cpad)
    ch_sum = jnp.sum(stats[:, :, 0, :Cout], axis=(0, 1))          # (Cout,)
    ch_ssq = jnp.sum(stats[:, :, 1, :Cout], axis=(0, 1))
    mean = ch_sum / M
    var = jnp.maximum(ch_ssq / M - mean * mean, 0.0)   # biased (BN training)
    scale = gamma.astype(jnp.float32) * jax.lax.rsqrt(var + eps)
    shift = beta.astype(jnp.float32) - mean * scale

    # ---- Pallas call 2: BN affine + ReLU, output written at Cout lanes ------
    out_flat = pl.pallas_call(
        _bn_relu_kernel,
        out_shape=jax.ShapeDtypeStruct((N, OH * OW, Cout), jnp.float32),
        grid_spec=pltpu.PrefetchScalarGridSpec(
            num_scalar_prefetch=0,
            grid=(N, MT),
            in_specs=[
                pl.BlockSpec((None, TM, Cpad), lambda n, m: (n, m, 0),
                             pipeline_mode=pl.Buffered(3)),
                pl.BlockSpec((1, Cout), lambda n, m: (0, 0)),
                pl.BlockSpec((1, Cout), lambda n, m: (0, 0)),
            ],
            out_specs=pl.BlockSpec((None, TM, Cout), lambda n, m: (n, m, 0)),
        ),
        compiler_params=pltpu.CompilerParams(
            dimension_semantics=("parallel", "parallel"),
            vmem_limit_bytes=VMEM_LIMIT),
    )(y_flat, scale[None, :], shift[None, :])

    out = out_flat.reshape(N, OH, OW, Cout)
    return jnp.transpose(out, (0, 3, 1, 2))


# ----------------------------------------------------------------------------
# Pure-JAX reference (f32) for a correctness sanity check
# ----------------------------------------------------------------------------
def _reference(x_nchw, weight_oihw, gamma, beta, *, stride=1, eps=1e-5):
    K = weight_oihw.shape[-1]
    p = K // 2
    y = jax.lax.conv_general_dilated(
        x_nchw, weight_oihw, (stride, stride), [(p, p), (p, p)],
        dimension_numbers=("NCHW", "OIHW", "NCHW"))
    mean = y.mean(axis=(0, 2, 3))
    var = y.var(axis=(0, 2, 3))
    yn = (y - mean[None, :, None, None]) * jax.lax.rsqrt(var + eps)[None, :, None, None]
    return jnp.maximum(yn * gamma[None, :, None, None] + beta[None, :, None, None], 0.0)


if __name__ == "__main__":
    key = jax.random.PRNGKey(0)
    k_x, k_w, k_g, k_b = jax.random.split(key, 4)

    N, Cin, H, W = 2, 4, 16, 16
    Cout, K, stride = 8, 3, 1

    x = jax.random.normal(k_x, (N, Cin, H, W), dtype=jnp.float32)
    fan_in = Cin * K * K
    weight = jax.random.normal(k_w, (Cout, Cin, K, K), dtype=jnp.float32) / np.sqrt(fan_in)
    gamma = 1.0 + 0.1 * jax.random.normal(k_g, (Cout,), dtype=jnp.float32)
    beta = 0.1 * jax.random.normal(k_b, (Cout,), dtype=jnp.float32)

    # m_tile_rows=128 -> TOH=8, MT=2 so the M-tiling path is exercised here.
    out = sim_conv_forward(x, weight, gamma, beta, stride=stride, m_tile_rows=128)
    out = jax.block_until_ready(out)

    ref = _reference(x, weight, gamma, beta, stride=stride)
    # bf16 conv inputs + bf16 intermediate -> looser tolerance vs f32 reference
    np.testing.assert_allclose(np.asarray(out), np.asarray(ref), atol=5e-2, rtol=5e-2)

    print("KERNEL_OK")
</pallas_src>

<mosaic_0001>
module attributes {stable_mosaic.version = 11 : i64} {
  func.func @_conv_stats_kernel(%arg0: i32, %arg1: i32, %arg2: memref<1x18x18x4xbf16, #tpu.memory_space<vmem>>, %arg3: memref<36x128xbf16, #tpu.memory_space<vmem>>, %arg4: memref<1x128x128xbf16, #tpu.memory_space<vmem>>, %arg5: memref<1x8x128xf32, #tpu.memory_space<vmem>>) attributes {dimension_semantics = [#tpu.dimension_semantics<parallel>, #tpu.dimension_semantics<parallel>], iteration_bounds = array<i64: 2, 2>, scalar_prefetch = 0 : i64, scratch_operands = 0 : i64, tpu.core_type = #tpu.core_type<tc>, window_params = [{transform_indices = @transform_0, window_bounds = array<i64: 1, 18, 18, 4>}, {pipeline_mode = #tpu.pipeline_mode<synchronous>, transform_indices = @transform_1, window_bounds = array<i64: 36, 128>}, {transform_indices = @transform_2, window_bounds = array<i64: 1, 128, 128>}, {transform_indices = @transform_3, window_bounds = array<i64: 1, 8, 128>}]} {
    %c8_i32 = arith.constant 8 : i32
    %0 = arith.muli %arg1, %c8_i32 : i32
    %1 = tpu.assume_multiple %0, 8 : i32
    %c0 = arith.constant 0 : index
    %2 = arith.index_cast %1 : i32 to index
    %c0_0 = arith.constant 0 : index
    %c0_1 = arith.constant 0 : index
    %3 = vector.load %arg2[%c0, %2, %c0_0, %c0_1] : memref<1x18x18x4xbf16, #tpu.memory_space<vmem>>, vector<1x10x18x4xbf16>
    %4 = vector.shape_cast %3 : vector<1x10x18x4xbf16> to vector<10x18x4xbf16>
    %5 = vector.extract_strided_slice %4 {offsets = [0, 0, 0], sizes = [8, 16, 4], strides = [1, 1, 1]} : vector<10x18x4xbf16> to vector<8x16x4xbf16>
    %6 = vector.shape_cast %5 : vector<8x16x4xbf16> to vector<128x4xbf16>
    %7 = vector.extract_strided_slice %4 {offsets = [0, 1, 0], sizes = [8, 16, 4], strides = [1, 1, 1]} : vector<10x18x4xbf16> to vector<8x16x4xbf16>
    %8 = vector.shape_cast %7 : vector<8x16x4xbf16> to vector<128x4xbf16>
    %9 = vector.extract_strided_slice %4 {offsets = [0, 2, 0], sizes = [8, 16, 4], strides = [1, 1, 1]} : vector<10x18x4xbf16> to vector<8x16x4xbf16>
    %10 = vector.shape_cast %9 : vector<8x16x4xbf16> to vector<128x4xbf16>
    %11 = vector.extract_strided_slice %4 {offsets = [1, 0, 0], sizes = [8, 16, 4], strides = [1, 1, 1]} : vector<10x18x4xbf16> to vector<8x16x4xbf16>
    %12 = vector.shape_cast %11 : vector<8x16x4xbf16> to vector<128x4xbf16>
    %13 = vector.extract_strided_slice %4 {offsets = [1, 1, 0], sizes = [8, 16, 4], strides = [1, 1, 1]} : vector<10x18x4xbf16> to vector<8x16x4xbf16>
    %14 = vector.shape_cast %13 : vector<8x16x4xbf16> to vector<128x4xbf16>
    %15 = vector.extract_strided_slice %4 {offsets = [1, 2, 0], sizes = [8, 16, 4], strides = [1, 1, 1]} : vector<10x18x4xbf16> to vector<8x16x4xbf16>
    %16 = vector.shape_cast %15 : vector<8x16x4xbf16> to vector<128x4xbf16>
    %17 = vector.extract_strided_slice %4 {offsets = [2, 0, 0], sizes = [8, 16, 4], strides = [1, 1, 1]} : vector<10x18x4xbf16> to vector<8x16x4xbf16>
    %18 = vector.shape_cast %17 : vector<8x16x4xbf16> to vector<128x4xbf16>
    %19 = vector.extract_strided_slice %4 {offsets = [2, 1, 0], sizes = [8, 16, 4], strides = [1, 1, 1]} : vector<10x18x4xbf16> to vector<8x16x4xbf16>
    %20 = vector.shape_cast %19 : vector<8x16x4xbf16> to vector<128x4xbf16>
    %21 = vector.extract_strided_slice %4 {offsets = [2, 2, 0], sizes = [8, 16, 4], strides = [1, 1, 1]} : vector<10x18x4xbf16> to vector<8x16x4xbf16>
    %22 = vector.shape_cast %21 : vector<8x16x4xbf16> to vector<128x4xbf16>
    %23 = tpu.concatenate %6, %8, %10, %12, %14, %16, %18, %20, %22 in 1 : vector<128x4xbf16>, vector<128x4xbf16>, vector<128x4xbf16>, vector<128x4xbf16>, vector<128x4xbf16>, vector<128x4xbf16>, vector<128x4xbf16>, vector<128x4xbf16>, vector<128x4xbf16> -> vector<128x36xbf16>
    %c0_2 = arith.constant 0 : index
    %c0_3 = arith.constant 0 : index
    %24 = vector.load %arg3[%c0_2, %c0_3] : memref<36x128xbf16, #tpu.memory_space<vmem>>, vector<36x128xbf16>
    %cst = arith.constant dense<0.000000e+00> : vector<128x128xf32>
    %25 = tpu.matmul %23, %24, %cst {dimension_numbers = #tpu.dot_dimension_numbers<[1], [0], [0], [1], [0, 0, 1, 1], [], []>} : vector<128x36xbf16>, vector<36x128xbf16>, vector<128x128xf32> -> vector<128x128xf32>
    %26 = arith.truncf %25 : vector<128x128xf32> to vector<128x128xbf16>
    %c0_4 = arith.constant 0 : index
    %c0_5 = arith.constant 0 : index
    %c0_6 = arith.constant 0 : index
    %27 = vector.load %arg4[%c0_4, %c0_5, %c0_6] : memref<1x128x128xbf16, #tpu.memory_space<vmem>>, vector<1x128x128xbf16>
    %28 = vector.shape_cast %27 : vector<1x128x128xbf16> to vector<128x128xbf16>
    %29 = vector.shape_cast %26 : vector<128x128xbf16> to vector<1x128x128xbf16>
    tpu.vector_store %arg4[%c0_4, %c0_5, %c0_6], %29 {strides = array<i32>} : memref<1x128x128xbf16, #tpu.memory_space<vmem>>, vector<1x128x128xbf16>,
    %cst_7 = arith.constant dense<0.000000e+00> : vector<128xf32>
    %30 = vector.multi_reduction <add>, %25, %cst_7 [0] : vector<128x128xf32> to vector<128xf32>
    %31 = vector.shape_cast %30 : vector<128xf32> to vector<1x128xf32>
    %32 = arith.mulf %25, %25 : vector<128x128xf32>
    %cst_8 = arith.constant dense<0.000000e+00> : vector<128xf32>
    %33 = vector.multi_reduction <add>, %32, %cst_8 [0] : vector<128x128xf32> to vector<128xf32>
    %34 = vector.shape_cast %33 : vector<128xf32> to vector<1x128xf32>
    %cst_9 = arith.constant 0.000000e+00 : f32
    %35 = vector.broadcast %cst_9 : f32 to vector<6x128xf32>
    %36 = tpu.concatenate %31, %34, %35 in 0 : vector<1x128xf32>, vector<1x128xf32>, vector<6x128xf32> -> vector<8x128xf32>
    %c0_10 = arith.constant 0 : index
    %c0_11 = arith.constant 0 : index
    %c0_12 = arith.constant 0 : index
    %37 = vector.load %arg5[%c0_10, %c0_11, %c0_12] : memref<1x8x128xf32, #tpu.memory_space<vmem>>, vector<1x8x128xf32>
    %38 = vector.shape_cast %37 : vector<1x8x128xf32> to vector<8x128xf32>
    %39 = vector.shape_cast %36 : vector<8x128xf32> to vector<1x8x128xf32>
    tpu.vector_store %arg5[%c0_10, %c0_11, %c0_12], %39 {strides = array<i32>} : memref<1x8x128xf32, #tpu.memory_space<vmem>>, vector<1x8x128xf32>,
    return
  }
  func.func @transform_0(%arg0: i32, %arg1: i32) -> (i32, i32, i32, i32) {
    %c0_i32 = arith.constant 0 : i32
    %c0_i32_0 = arith.constant 0 : i32
    %c0_i32_1 = arith.constant 0 : i32
    %c0_i32_2 = arith.constant 0 : i32
    return %arg0, %c0_i32, %c0_i32_0, %c0_i32_1 : i32, i32, i32, i32
  }
  func.func @transform_1(%arg0: i32, %arg1: i32) -> (i32, i32) {
    %c0_i32 = arith.constant 0 : i32
    %c0_i32_0 = arith.constant 0 : i32
    %c0_i32_1 = arith.constant 0 : i32
    return %c0_i32, %c0_i32_0 : i32, i32
  }
  func.func @transform_2(%arg0: i32, %arg1: i32) -> (i32, i32, i32) {
    %c0_i32 = arith.constant 0 : i32
    %c0_i32_0 = arith.constant 0 : i32
    return %arg0, %arg1, %c0_i32 : i32, i32, i32
  }
  func.func @transform_3(%arg0: i32, %arg1: i32) -> (i32, i32, i32) {
    %c0_i32 = arith.constant 0 : i32
    %c0_i32_0 = arith.constant 0 : i32
    return %arg0, %arg1, %c0_i32 : i32, i32, i32
  }
}

</mosaic_0001>

<bundles_post_ra>
// kernel: tpu_custom_call.1
= control target key start
LH: loop header
LB: loop body
LE: loop exit
PB: predicated region body
PF: predicated region fallthrough
CT: control target
= control target key end

     0   :  { %9 = vsyncpa [#allocation3], 0  ;;  %s2529_s0 = inlined_call_operand.vmem [shape: bf16[2,18,18,4], index: 0, kind: input, shape index: {}]   ;;  %s2530_s1 = inlined_call_operand.vmem [shape: bf16[36,128], index: 1, kind: input, shape index: {}]   ;;  %s2531_s2 = inlined_call_operand.hbm [shape: bf16[2,256,128], index: 2, kind: output, shape index: {0}]   ;;  %s2532_s3 = inlined_call_operand.hbm [shape: f32[2,16,128], index: 3, kind: output, shape index: {1}]  }
   0x1   :  { %11 = vsyncpa [#allocation3 + $0x1], 0 }
   0x2   :  { %12 = vsyncpa [#allocation5], 0 }
   0x3   :  { %14 = vsyncpa [#allocation5 + $0x1], 0  ;;  %s1818_s12 = smov 0   ;;  %s1820_s13 = smov 0  }
   0x4   :  { %s1822_s14 = smov 0   ;;  %s1824_s15 = smov 0  }
   0x5   :  { %s1826_s16 = smov 0   ;;  %s1828_s17 = smov 0  }
   0x6   :  { %s1830_s18 = smov 0   ;;  %s1832_s19 = smov 0  }
   0x7 LB: > { %s1368_s20 = sadd.s32 4294967295, %s1785_s19   ;;  %s1369_s21 = sadd.s32 4294967294, %s1785_s19   ;;  %s1785_s19 = sphi %s1832_s19, %s20_s19   ;;  %s1781_s18 = sphi %s1830_s18, %s2545_s18   ;;  %s1777_s17 = sphi %s1828_s17, %s2544_s17   ;;  %s1773_s16 = sphi %s1826_s16, %s2543_s16   ;;  %s1769_s15 = sphi %s1824_s15, %s2542_s15   ;;  %s1765_s14 = sphi %s1822_s14, %s2541_s14   ;;  %s1761_s13 = sphi %s1820_s13, %s2540_s13   ;;  %s1757_s12 = sphi %s1818_s12, %s2539_s12  }
   0x8   : > { %s29_s22 = sadd.s32 1, %s1777_s17  ;;  %s32_s23 = sadd.s32 1, %s1781_s18 }
   0x9   : > { %p30_p0 = scmp.ge.s32.totalorder %s29_s22, 2  ;;  %p98_p1 = scmp.ne.s32.totalorder %s1765_s14, %s1761_s13 }
   0xa   : > { %p99_p2 = scmp.eq.s32.totalorder %s1368_s20, 3  ;;  %p104_p5 = scmp.ne.s32.totalorder %s1761_s13, %s1757_s12 }
   0xb   : > { %s2547_s22 = smov (%p30_p0, %s29_s22), 0  ;;  %s2549_s23 = smov (!%p30_p0, %s32_s23), %s1781_s18 }
   0xc   : > { %s84_s24 = ssub.s32 %s1777_s17, %s2547_s22  ;;  %p1869_p3 = por %p99_p2, %p98_p1 }
   0xd   : > { %p34_p4 = scmp.ge.s32.totalorder %s2549_s23, 2  ;;  %p105_p6 = scmp.eq.s32.totalorder %s1369_s21, 3 }
   0xe   : > { %p1372_p7 = scmp.ge.s32.totalorder %s1785_s19, 1  ;;  %p162_p9 = scmp.lt.s32.totalorder %s1785_s19, 5 }
   0xf   : > { %s2551_s23 = smov (%p34_p4, %s2549_s23), 0  ;;  %p1878_p8 = por %p105_p6, %p104_p5 }
  0x10   : > { %s83_s27 = ssub.s32 %s1781_s18, %s2551_s23  ;;  %s88_s28 = sadd.s32 1, %s1765_s14 }
  0x11   : > { %s85_s29 = sor.u32 %s84_s24, %s83_s27  ;;  %p163_p10 = pnand %p1372_p7, %p162_p9 }
  0x12   : > { %p86_p11 = scmp.eq.s32.totalorder %s85_s29, 0  ;;  %p191_p12 = scmp.lt.s32.totalorder (!%p163_p10), %s1773_s16, 1  ;;  %vm451_vm0 = vcmask (!%p163_p10), 1042432   ;;  %vm452_vm1 = vcmask (!%p163_p10), 1046532   ;;  %vm232_vm2 = vsmask.f32 (!%p163_p10), 3328 }
  0x13   : > { %166 = sbr.rel (%p163_p10) target bundleno = 542 (0x21e), region = 28  ;;  %vm233_vm3 = vsmask.f32 (!%p163_p10), 7440  ;;  %s1787_s11 = smov (!%p163_p10), 12   ;;  %vm1941_vm4 = vmor (!%p163_p10), %vm451_vm0, %vm452_vm1  ;;  %vm977_vm6 = vcmask (!%p163_p10), 1041408   ;;  %vm796_vm7 = vcmask (!%p163_p10), 31744  }
  0x14   : > { %s1887_s30 = scalar_select %p86_p11, %s1765_s14, %s88_s28  }
  0x15   : > { %s1455_s5 = smul.u32 (!%p163_p10), 96, %s1769_s15  ;;  %s1788_s20 = smov (!%p163_p10), 24   ;;  %vm1977_vm5 = vmor (!%p163_p10), %vm232_vm2, %vm233_vm3  ;;  %vm821_vm8 = vcmask (!%p163_p10), 64512   ;;  %vm838_vm9 = vcmask (!%p163_p10), 97280   ;;  %vm855_vm10 = vcmask (!%p163_p10), 130048   ;;  %vm872_vm11 = vcmask (!%p163_p10), 162816  }
  0x16   : > { %s1789_s21 = smov (!%p163_p10), 20   ;;  %s1790_s24 = smov (!%p163_p10), 8   ;;  %vm889_vm12 = vcmask (!%p163_p10), 195584   ;;  %vm906_vm13 = vcmask (!%p163_p10), 228352   ;;  %vm923_vm14 = vcmask (!%p163_p10), 261120   ;;  %vm960_vm15 = vcmask (!%p163_p10), 293888  }
  0x17   : > { %s1791_s27 = smov (!%p163_p10), 4   ;;  %s1793_s7 = smov (!%p163_p10), 28  }
  0x18   : > { %s1794_s8 = smov (!%p163_p10), 32   ;;  %s1449_s28 = sshll.u32 (!%p163_p10), %s1773_s16, 5 }
  0x1a   : > { %s192_s4 = scalar_select %p191_p12, %s1773_s16, 1 }
  0x1c   : > { %s1560_s6 = smul.u32 216, %s192_s4 }
  0x1e   : > { %s195_s9 = scalar_lea.vmem %s2529_s0, %s1560_s6  ;;  %s1792_s6 = smov 16  }
  0x1f   : > { %s1895_s10 = scalar_lea.vmem %s195_s9, %s1455_s5 }
  0x20   : > { %v1898_v0 = vld [vmem:[%s1895_s10 + $0x18] sm:$0xf]  ;;  %v1901_v1 = vld [vmem:[%s1895_s10 + $0x1c] sm:$0xf]  ;;  %v205_v2 = vld [vmem:[%s1895_s10 + $0xc] sm:$0xf] }
  0x21   : > { %v297_v3 = vshrl.u32 %v1901_v1, 16  ;;  %v1907_v4 = vcombine.low %v1898_v0, %v1901_v1  ;;  %v284_v5 = vshrl.u32 %v1898_v0, 16  ;;  %v287_v6 = vshll.u32 %v1898_v0, 16  ;;  %v1912_v7 = vld [vmem:[%s1895_s10 + $0x10] sm:$0xf] }
  0x22   : > { %v269_v8 = vshll.u32 %v1912_v7, 16  ;;  %v273_v9 = vshrl.u32 %v1912_v7, 16  ;;  %v1917_v10 = vcombine.low %v205_v2, %v1912_v7  ;;  %v260_v11 = vshrl.u32 %v205_v2, 16  ;;  %v1920_v12 = vld [vmem:[%s1895_s10 + $0x24] sm:$0xf] }
  0x23   : > { %687 = vrot.lane.b32.xlu1 %v1907_v4, %s1787_s11  ;;  %v263_v13 = vshll.u32 %v205_v2, 16  ;;  %v1925_v14 = vld [vmem:[%s1895_s10 + $0x28] sm:$0xf]  ;;  %v308_v15 = vshrl.u32 %v1920_v12, 16  ;;  %v311_v16 = vshll.u32 %v1920_v12, 16  ;;  %v1380_v17 = vrot.slane %v205_v2, 9 }
  0x24   : > { %v1929_v18 = vrot.slane %v273_v9, 4  ;;  %685 = vrot.lane.b32.xlu0 %v1917_v10, %s1787_s11  ;;  %v262_v19 = vrot.slane %v260_v11, 4  ;;  %v321_v20 = vshrl.u32 %v1925_v14, 16  ;;  %v1936_v21 = vcombine.low %v1920_v12, %v1925_v14  ;;  %v207_v22 = vld [vmem:[%s1895_s10 + $0x14] sm:$0x1] }
  0x25   : > { %v265_v24 = vrot.slane %v263_v13, 5  ;;  %v463_v25 = vrot.slane %v1912_v7, 5  ;;  %v466_v26 = vrot.slane %v207_v22, 5  ;;  %v1947_v27 = vld [vmem:[%s1895_s10] sm:$0xf]  ;;  %v1381_v28 = vrot.slane %v1898_v0, 9 }
  0x26   : > { %v1951_v29 = vld [vmem:[%s1895_s10 + $0x4] sm:$0xf]  ;;  %v204_v30 = vld [vmem:[%s1895_s10 + $0x8] sm:$0x1]  ;;  %v1379_v31 = vrot.slane %v1947_v27, 9  ;;  %v236_v32 = vshrl.u32 %v1947_v27, 16 }
  0x27   : > { %744 = vrot.lane.b32.xlu1 %v1936_v21, %s1788_s20  ;;  %v464_v33 = vsel %vm1941_vm4, %v1380_v17, %v463_v25  ;;  %v465_v34 = vrot.slane %v463_v25, 4  ;;  %v456_v35 = vrot.slane %v1951_v29, 5  ;;  %v459_v36 = vrot.slane %v204_v30, 5  ;;  %v210_v41 = vld [vmem:[%s1895_s10 + $0x20] sm:$0x1] }
  0x28   : > { %742 = vrot.lane.b32.xlu0 %v1907_v4, %s1788_s20  ;;  %v238_v37 = vrot.slane %v236_v32, 4  ;;  %v239_v38 = vshll.u32 %v1947_v27, 16  ;;  %v245_v39 = vshll.u32 %v1951_v29, 16  ;;  %v249_v40 = vshrl.u32 %v1951_v29, 16 }
  0x29   : > { %v467_v42 = vsel %vm1941_vm4, %v465_v34, %v466_v26  ;;  %v457_v43 = vsel %vm1941_vm4, %v1379_v31, %v456_v35  ;;  %v458_v44 = vrot.slane %v456_v35, 4  ;;  %v255_v45 = vshll.u32 %v204_v30, 16  ;;  %v2006_v30 = vld [vmem:[%s1895_s10 + $0x2c] sm:$0x1] }
  0x2a   : > { %v1406_v46 = vcombine.low %v464_v33, %v467_v42  ;;  %v241_v47 = vrot.slane %v239_v38, 5  ;;  %v247_v48 = vrot.slane %v245_v39, 5  ;;  %v251_v49 = vrot.slane %v249_v40, 4  ;;  %v1657_v38 = vld [vmem:[%s2530_s1 + $0x8] sm:$0xff]  }
  0x2b   : > { %v460_v50 = vsel %vm1941_vm4, %v458_v44, %v459_v36  ;;  %v257_v51 = vrot.slane %v255_v45, 5  ;;  %v470_v52 = vrot.slane %v1901_v1, 5  ;;  %v473_v53 = vrot.slane %v210_v41, 5  ;;  %v215_v45 = vld [vmem:[%s1895_s10 + $0x34] sm:$0xf] }
  0x2c   : > { %723 = vrot.lane.b32.xlu0 %v1406_v46, %s1789_s21  ;;  %v1405_v54 = vcombine.low %v457_v43, %v460_v50  ;;  %v242_v55 = vor.u32 %v241_v47, %v238_v37  ;;  %v252_v56 = vor.u32 %v251_v49, %v247_v48  ;;  %v266_v57 = vor.u32 %v265_v24, %v262_v19  ;;  %v2022_v37 = vld [vmem:[%s1895_s10 + $0x30] sm:$0xf] }
  0x2d   : > { %v471_v59 = vsel %vm1941_vm4, %v1381_v28, %v470_v52  ;;  %v472_v60 = vrot.slane %v470_v52, 4  ;;  %v271_v61 = vrot.slane %v269_v8, 5  ;;  %v279_v62 = vshll.u32 %v207_v22, 16 }
  0x2e   : > { %666 = vrot.lane.b32.xlu1 %v1405_v54, %s1790_s24  ;;  %v243_v63 = vrot.slane %v242_v55, 4  ;;  %v253_v2 = vrot.slane %v252_v56, 4  ;;  %v267_v9 = vrot.slane %v266_v57, 4  ;;  %v286_v11 = vrot.slane %v284_v5, 4  ;;  %v216_v56 = vld [vmem:[%s1895_s10 + $0x38] sm:$0x1] }
  0x2f   : > { %v474_v13 = vsel %vm1941_vm4, %v472_v60, %v473_v53  ;;  %v276_v17 = vor.u32 %v1929_v18, %v271_v61  ;;  %v281_v19 = vrot.slane %v279_v62, 5  ;;  %v289_v7 = vrot.slane %v287_v6, 5 }
  0x30   : > { %v248_v8 = vsel %vm1977_vm5, %v243_v63, %v247_v48  ;;  %v258_v22 = vsel %vm1977_vm5, %v253_v2, %v257_v51  ;;  %v1997_v24 = vcombine.low %v471_v59, %v474_v13  ;;  %v272_v5 = vsel %vm1977_vm5, %v267_v9, %v271_v61  ;;  %v2045_v61 = vld [vmem:[%s1895_s10 + $0x3c] sm:$0xf] }
  0x31   : > { %v1397_v25 = vcombine.low %v248_v8, %v258_v22  ;;  %v277_v26 = vrot.slane %v276_v17, 4  ;;  %v290_v28 = vor.u32 %v289_v7, %v286_v11  ;;  %v293_v18 = vshll.u32 %v1901_v1, 16  ;;  %v2054_v17 = vld [vmem:[%s1895_s10 + $0x40] sm:$0xf] }
  0x32   : > { %668 = vrot.lane.b32.xlu1 %v1406_v46, %s1790_s24  ;;  %v299_v0 = vrot.slane %v297_v3, 4  ;;  %v303_v6 = vshll.u32 %v210_v41, 16  ;;  %v310_v31 = vrot.slane %v308_v15, 4  ;;  %v313_v32 = vrot.slane %v311_v16, 5  ;;  %v1656_v3 = vld [vmem:[%s2530_s1] sm:$0xff]  }
  0x33   : > { %626 = vrot.lane.b32.xlu0 %v1397_v25, %s1791_s27  ;;  %v282_v33 = vsel %vm1977_vm5, %v277_v26, %v281_v19  ;;  %v291_v34 = vrot.slane %v290_v28, 4  ;;  %v295_v35 = vrot.slane %v293_v18, 5  ;;  %v317_v1 = vshll.u32 %v1925_v14, 16  ;;  %1530 = vmatprep.subr.bf16.mxu0 %v1656_v3 }
  0x34   : > { %v1398_v36 = vcombine.low %v272_v5, %v282_v33  ;;  %v314_v15 = vor.u32 %v313_v32, %v310_v31  ;;  %v323_v16 = vrot.slane %v321_v20, 4  ;;  %v305_v40 = vrot.slane %v303_v6, 5  ;;  %1552 = vmatprep.subr.bf16.mxu1 %v1656_v3  ;;  %1531 = vmatpush3.bf16.msra.mxu0 %v1656_v3  ;;  %v2066_v31 = vld [vmem:[%s1895_s10 + $0x44] sm:$0x1] }
  0x35   : > { %v300_v39 = vor.u32 %v299_v0, %v295_v35  ;;  %v319_v41 = vrot.slane %v317_v1, 5  ;;  %v327_v42 = vshll.u32 %v2006_v30, 16  ;;  %v296_v43 = vsel %vm1977_vm5, %v291_v34, %v295_v35  ;;  %1532 = vmatprep.subr.bf16.mxu0 %v1657_v38  ;;  %1555 = vmatpush3.bf16.msra.mxu1 %v1656_v3 }
  0x36   : > { %725 = vrot.lane.b32.xlu1 %v1997_v24, %s1789_s21  ;;  %v315_v20 = vrot.slane %v314_v15, 4  ;;  %v477_v44 = vrot.slane %v1925_v14, 5  ;;  %v332_v49 = vshrl.u32 %v2022_v37, 16  ;;  %v1382_v50 = vrot.slane %v1920_v12, 9  ;;  %1553 = vmatprep.subr.bf16.mxu1 %v1657_v38 }
  0x37   : > { %628 = vrot.lane.b32.xlu0 %v1398_v36, %s1791_s27  ;;  %v301_v46 = vrot.slane %v300_v39, 4  ;;  %v324_v47 = vor.u32 %v323_v16, %v319_v41  ;;  %v329_v48 = vrot.slane %v327_v42, 5  ;;  %v480_v51 = vrot.slane %v2006_v30, 5 }
  0x38   : > { %v335_v52 = vshll.u32 %v2022_v37, 16  ;;  %v320_v53 = vsel %vm1977_vm5, %v315_v20, %v319_v41  ;;  %v345_v55 = vshrl.u32 %v215_v45, 16  ;;  %v479_v59 = vrot.slane %v477_v44, 4  ;;  %1533 = vmatpush3.bf16.msra.mxu0 %v1657_v38 }
  0x39   : > { %v306_v14 = vsel %vm1977_vm5, %v301_v46, %v305_v40  ;;  %v325_v54 = vrot.slane %v324_v47, 4  ;;  %v334_v60 = vrot.slane %v332_v49, 4  ;;  %v341_v63 = vshll.u32 %v215_v45, 16  ;;  %1556 = vmatpush3.bf16.msra.mxu1 %v1657_v38  ;;  %v2083_v40 = vld [vmem:[%s1895_s10 + $0x4c] sm:$0xf] }
  0x3a   : > { %v1399_v57 = vcombine.low %v296_v43, %v306_v14  ;;  %v337_v12 = vrot.slane %v335_v52, 5  ;;  %v347_v2 = vrot.slane %v345_v55, 4  ;;  %v351_v13 = vshll.u32 %v216_v56, 16 }
  0x3b   : > { %704 = vrot.lane.b32.xlu0 %v1398_v36, %s1792_s6  ;;  %v330_v62 = vsel %vm1977_vm5, %v325_v54, %v329_v48  ;;  %v478_v19 = vsel %vm1941_vm4, %v1382_v50, %v477_v44  ;;  %v343_v7 = vrot.slane %v341_v63, 5  ;;  %v484_v8 = vrot.slane %v215_v45, 5  ;;  %v2075_v36 = vld [vmem:[%s1895_s10 + $0x48] sm:$0xf] }
  0x3c   : > { %706 = vrot.lane.b32.xlu1 %v1399_v57, %s1792_s6  ;;  %v2051_v9 = vcombine.low %v320_v53, %v330_v62  ;;  %v338_v11 = vor.u32 %v337_v12, %v334_v60  ;;  %v356_v22 = vshrl.u32 %v2045_v61, 16  ;;  %v481_v5 = vsel %vm1941_vm4, %v479_v59, %v480_v51  ;;  %v222_v51 = vld [vmem:[%s1895_s10 + $0x50] sm:$0x1]  ;;  %v2119_v60 = vld [vmem:[%s1895_s10 + $0x54] sm:$0xf] }
  0x3d   : > { %v1383_v25 = vrot.slane %v2022_v37, 9  ;;  %v487_v26 = vrot.slane %v216_v56, 5  ;;  %v359_v28 = vshll.u32 %v2045_v61, 16  ;;  %v348_v0 = vor.u32 %v347_v2, %v343_v7 }
  0x3e   : > { %v339_v18 = vrot.slane %v338_v11, 4  ;;  %v486_v6 = vrot.slane %v484_v8, 4  ;;  %v369_v30 = vshrl.u32 %v2054_v17, 16  ;;  %v353_v32 = vrot.slane %v351_v13, 5 }
  0x3f   : > { %761 = vrot.lane.b32.xlu0 %v1399_v57, %s1793_s7  ;;  %v358_v33 = vrot.slane %v356_v22, 4  ;;  %v361_v34 = vrot.slane %v359_v28, 5  ;;  %v365_v35 = vshll.u32 %v2054_v17, 16  ;;  %v2072_v1 = vcombine.low %v2022_v37, %v215_v45 }
  0x40   : > { %763 = vrot.lane.b32.xlu1 %v2051_v9, %s1793_s7  ;;  %v349_v3 = vrot.slane %v348_v0, 4  ;;  %v485_v15 = vsel %vm1941_vm4, %v1383_v25, %v484_v8  ;;  %v488_v16 = vsel %vm1941_vm4, %v486_v6, %v487_v26  ;;  %v375_v39 = vshll.u32 %v2066_v31, 16  ;;  %v2135_v8 = vld [vmem:[%s1895_s10 + $0x58] sm:$0xf] }
  0x41   : > { %v362_v38 = vor.u32 %v361_v34, %v358_v33  ;;  %v2087_v37 = vcombine.low %v478_v19, %v481_v5  ;;  %v344_v41 = vsel %vm1977_vm5, %v339_v18, %v343_v7  ;;  %v2093_v42 = vcombine.low %v2045_v61, %v2054_v17 }
  0x42   : > { %v371_v43 = vrot.slane %v369_v30, 4  ;;  %v354_v20 = vsel %vm1977_vm5, %v349_v3, %v353_v32  ;;  %v2098_v44 = vrot.slane %v365_v35, 5  ;;  %v491_v45 = vrot.slane %v2054_v17, 5  ;;  %v225_v30 = vld [vmem:[%s1895_s10 + $0x5c] sm:$0x1] }
  0x43   : > { %780 = vrot.lane.b32.xlu0 %v1997_v24, %s1794_s8  ;;  %v380_v46 = vshrl.u32 %v2075_v36, 16  ;;  %v2102_v47 = vcombine.low %v485_v15, %v488_v16  ;;  %v2104_v48 = vrot.slane %v362_v38, 4  ;;  %v383_v49 = vshll.u32 %v2075_v36, 16 }
  0x44   : > { %630 = vrot.lane.b32.xlu1 %v1399_v57, %s1791_s27  ;;  %v393_v50 = vshrl.u32 %v2083_v40, 16  ;;  %v2109_v52 = vrot.slane %v375_v39, 5  ;;  %v1384_v14 = vrot.slane %v2045_v61, 9  ;;  %v494_v53 = vrot.slane %v2066_v31, 5 }
  0x45   : > { %v382_v54 = vrot.slane %v380_v46, 4  ;;  %v2115_v55 = vcombine.low %v344_v41, %v354_v20  ;;  %v385_v56 = vrot.slane %v383_v49, 5  ;;  %v389_v57 = vshll.u32 %v2083_v40, 16  ;;  %v2155_v20 = vld [vmem:[%s1895_s10 + $0x60] sm:$0xf] }
  0x46   : > { %v395_v59 = vrot.slane %v393_v50, 4  ;;  %v372_v12 = vor.u32 %v371_v43, %v2098_v44  ;;  %v2126_v62 = vrot.slane %v491_v45, 4  ;;  %v399_v63 = vshll.u32 %v222_v51, 16 }
  0x47   : > { %782 = vrot.lane.b32.xlu0 %v2087_v37, %s1794_s8  ;;  %v1385_v2 = vrot.slane %v2075_v36, 9  ;;  %v368_v11 = vsel %vm1977_vm5, %v2104_v48, %v2098_v44  ;;  %v386_v13 = vor.u32 %v385_v56, %v382_v54  ;;  %v391_v19 = vrot.slane %v389_v57, 5  ;;  %v2164_v54 = vld [vmem:[%s1895_s10 + $0x64] sm:$0xf] }
  0x48   : > { %632 = vrot.lane.b32.xlu1 %v2051_v9, %s1791_s27  ;;  %v498_v7 = vrot.slane %v2083_v40, 5  ;;  %v401_v22 = vrot.slane %v399_v63, 5  ;;  %v501_v5 = vrot.slane %v222_v51, 5  ;;  %v404_v25 = vshrl.u32 %v2119_v60, 16 }
  0x49   : > { %v407_v26 = vshll.u32 %v2119_v60, 16  ;;  %v387_v28 = vrot.slane %v386_v13, 4  ;;  %v396_v18 = vor.u32 %v395_v59, %v391_v19  ;;  %v373_v32 = vrot.slane %v372_v12, 4 }
  0x4a   : > { %v499_v0 = vsel %vm1941_vm4, %v1385_v2, %v498_v7  ;;  %v500_v6 = vrot.slane %v498_v7, 4  ;;  %v417_v33 = vshrl.u32 %v2135_v8, 16  ;;  %v406_v34 = vrot.slane %v404_v25, 4  ;;  %v228_v7 = vld [vmem:[%s1895_s10 + $0x68] sm:$0x1] }
  0x4b   : > { %670 = vrot.lane.b32.xlu0 %v1997_v24, %s1790_s24  ;;  %v409_v35 = vrot.slane %v407_v26, 5  ;;  %v392_v24 = vsel %vm1977_vm5, %v387_v28, %v391_v19  ;;  %v397_v3 = vrot.slane %v396_v18, 4  ;;  %v413_v16 = vshll.u32 %v2135_v8, 16 }
  0x4c   : > { %672 = vrot.lane.b32.xlu1 %v2087_v37, %s1790_s24  ;;  %v502_v15 = vsel %vm1941_vm4, %v500_v6, %v501_v5  ;;  %v419_v41 = vrot.slane %v417_v33, 4  ;;  %v423_v43 = vshll.u32 %v225_v30, 16  ;;  %v1386_v50 = vrot.slane %v2119_v60, 9 }
  0x4d   : > { %v2152_v38 = vcombine.low %v499_v0, %v502_v15  ;;  %v410_v39 = vor.u32 %v409_v35, %v406_v34  ;;  %v402_v46 = vsel %vm1977_vm5, %v397_v3, %v401_v22  ;;  %v415_v49 = vrot.slane %v413_v16, 5  ;;  %v2191_v34 = vld [vmem:[%s1895_s10 + $0x6c] sm:$0xf]  ;;  %v2198_v15 = vld [vmem:[%s1895_s10 + $0x70] sm:$0xf] }
  0x4e   : > { %v505_v51 = vrot.slane %v2135_v8, 5  ;;  %v2168_v56 = vcombine.low %v392_v24, %v402_v46  ;;  %v425_v59 = vrot.slane %v423_v43, 5  ;;  %v508_v12 = vrot.slane %v225_v30, 5 }
  0x4f   : > { %689 = vrot.lane.b32.xlu0 %v1936_v21, %s1787_s11  ;;  %v411_v57 = vrot.slane %v410_v39, 4  ;;  %v420_v63 = vor.u32 %v419_v41, %v415_v49  ;;  %v511_v19 = vshrl.u32 %v2155_v20, 16  ;;  %v378_v22 = vsel %vm1977_vm5, %v373_v32, %v2109_v52 }
  0x50   : > { %691 = vrot.lane.b32.xlu1 %v2072_v1, %s1787_s11  ;;  %v506_v2 = vsel %vm1941_vm4, %v1386_v50, %v505_v51  ;;  %v507_v13 = vrot.slane %v505_v51, 4  ;;  %v514_v25 = vshll.u32 %v2155_v20, 16  ;;  %v524_v26 = vshrl.u32 %v2164_v54, 16 }
  0x51   : > { %v416_v5 = vsel %vm1977_vm5, %v411_v57, %v415_v49  ;;  %v421_v28 = vrot.slane %v420_v63, 4  ;;  %v513_v0 = vrot.slane %v511_v19, 4  ;;  %v520_v6 = vshll.u32 %v2164_v54, 16  ;;  %v231_v63 = vld [vmem:[%s1895_s10 + $0x74] sm:$0x1] }
  0x52   : > { %v509_v18 = vsel %vm1941_vm4, %v507_v13, %v508_v12  ;;  %v516_v30 = vrot.slane %v514_v25, 5  ;;  %v526_v32 = vrot.slane %v524_v26, 4  ;;  %v530_v33 = vshll.u32 %v228_v7, 16 }
  0x53   : > { %708 = vrot.lane.b32.xlu0 %v2051_v9, %s1792_s6  ;;  %v2188_v52 = vcombine.low %v506_v2, %v509_v18  ;;  %v426_v9 = vsel %vm1977_vm5, %v421_v28, %v425_v59  ;;  %v522_v35 = vrot.slane %v520_v6, 5  ;;  %v1387_v24 = vrot.slane %v2155_v20, 9 }
  0x54   : > { %710 = vrot.lane.b32.xlu1 %v2115_v55, %s1792_s6  ;;  %v539_v3 = vrot.slane %v2164_v54, 5  ;;  %v2200_v16 = vcombine.low %v416_v5, %v426_v9  ;;  %v517_v39 = vor.u32 %v516_v30, %v513_v0  ;;  %v532_v41 = vrot.slane %v530_v33, 5 }
  0x55   : > { %v542_v43 = vrot.slane %v228_v7, 5  ;;  %v527_v46 = vor.u32 %v526_v32, %v522_v35  ;;  %v545_v51 = vshrl.u32 %v2191_v34, 16  ;;  %v1402_v57 = vcombine.low %v368_v11, %v378_v22 }
  0x56   : > { %v540_v49 = vsel %vm1941_vm4, %v1387_v24, %v539_v3  ;;  %v541_v50 = vrot.slane %v539_v3, 4  ;;  %v518_v59 = vrot.slane %v517_v39, 4  ;;  %v548_v12 = vshll.u32 %v2191_v34, 16  ;;  %v1658_v39 = vld [vmem:[%s2530_s1 + $0x10] ss:$0 sps:$4 sm:$0x33]  }
  0x57   : > { %727 = vrot.lane.b32.xlu0 %v2087_v37, %s1789_s21  ;;  %v558_v37 = vshrl.u32 %v2198_v15, 16  ;;  %v528_v2 = vrot.slane %v527_v46, 4  ;;  %v547_v19 = vrot.slane %v545_v51, 4  ;;  %v554_v7 = vshll.u32 %v2198_v15, 16  ;;  %1558 = vmatprep.subr.msk.bf16.mxu0 %vm977_vm6, %v1658_v39 }
  0x58   : > { %729 = vrot.lane.b32.xlu1 %v2102_v47, %s1789_s21  ;;  %v543_v13 = vsel %vm1941_vm4, %v541_v50, %v542_v43  ;;  %v523_v5 = vsel %vm1977_vm5, %v518_v59, %v522_v35  ;;  %v550_v44 = vrot.slane %v548_v12, 5  ;;  %v564_v26 = vshll.u32 %v231_v63, 16  ;;  %1559 = vmatprep.subr.msk.bf16.mxu1 %vm977_vm6, %v1658_v39 }
  0x59   : > { %v2222_v25 = vcombine.low %v540_v49, %v543_v13  ;;  %v560_v48 = vrot.slane %v558_v37, 4  ;;  %v533_v11 = vsel %vm1977_vm5, %v528_v2, %v532_v41  ;;  %v556_v22 = vrot.slane %v554_v7, 5 }
  0x5a   : > { %v1388_v28 = vrot.slane %v2191_v34, 9  ;;  %v2231_v18 = vcombine.low %v523_v5, %v533_v11  ;;  %v551_v0 = vor.u32 %v550_v44, %v547_v19  ;;  %v573_v6 = vrot.slane %v2198_v15, 5 }
  0x5b   : > { %746 = vrot.lane.b32.xlu0 %v2072_v1, %s1788_s20  ;;  %v576_v30 = vrot.slane %v231_v63, 5  ;;  %v561_v32 = vor.u32 %v560_v48, %v556_v22  ;;  %v566_v33 = vrot.slane %v564_v26, 5  ;;  %v1389_v9 = vcombine.low %v1947_v27, %v1951_v29 }
  0x5c   : > { %748 = vrot.lane.b32.xlu1 %v2093_v42, %s1788_s20  ;;  %v552_v35 = vrot.slane %v551_v0, 4  ;;  %v2238_v24 = vsel %vm1941_vm4, %v1388_v28, %v573_v6  ;;  %v575_v3 = vrot.slane %v573_v6, 4  ;;  %v492_v43 = vsel %vm1941_vm4, %v1384_v14, %v491_v45 }
  0x5d   : > { %v562_v41 = vrot.slane %v561_v32, 4  ;;  %v495_v46 = vsel %vm1941_vm4, %v2126_v62, %v494_v53  ;;  %v979_v31 = vsel %vm977_vm6, %v1658_v39, 0  ;;  %v2278_v23 = vcombine.low %v2075_v36, %v2083_v40 }
  0x5e   : > { %v557_v49 = vsel %vm1977_vm5, %v552_v35, %v556_v22  ;;  %v577_v50 = vsel %vm1941_vm4, %v575_v3, %v576_v30  ;;  %v1410_v45 = vcombine.low %v492_v43, %v495_v46  ;;  %1535 = vmatpush3.bf16.msra.mxu0 %v979_v31  ;;  %1557 = vmatpush3.bf16.msra.mxu1 %v979_v31 }
  0x5f   : > { %765 = vrot.lane.b32.xlu0 %v2115_v55, %s1793_s7  ;;  %v567_v17 = vsel %vm1977_vm5, %v562_v41, %v566_v33  ;;  %v1418_v61 = vcombine.low %v2238_v24, %v577_v50  ;;  %v2292_v58 = vcombine.low %v2119_v60, %v2135_v8  ;;  %v1413_v36 = vcombine.low %v2155_v20, %v2164_v54 }
  0x60   : > { %767 = vrot.lane.b32.xlu1 %v1402_v57, %s1793_s7  ;;  %v1417_v51 = vcombine.low %v557_v49, %v567_v17  ;;  %v1416_v14 = vcombine.low %v2191_v34, %v2198_v15 }
  0x63   : > { %784 = vrot.lane.b32.xlu0 %v2102_v47, %s1794_s8 }
  0x64   : > { %634 = vrot.lane.b32.xlu1 %v2115_v55, %s1791_s27 }
  0x67   : > { %786 = vrot.lane.b32.xlu0 %v1410_v45, %s1794_s8 }
  0x68   : > { %636 = vrot.lane.b32.xlu1 %v1402_v57, %s1791_s27 }
  0x6b   : > { %674 = vrot.lane.b32.xlu0 %v2102_v47, %s1790_s24 }
  0x6c   : > { %676 = vrot.lane.b32.xlu1 %v1410_v45, %s1790_s24 }
  0x6f   : > { %693 = vrot.lane.b32.xlu0 %v2093_v42, %s1787_s11 }
  0x70   : > { %695 = vrot.lane.b32.xlu1 %v2278_v23, %s1787_s11 }
  0x73   : > { %712 = vrot.lane.b32.xlu0 %v1402_v57, %s1792_s6 }
  0x74   : > { %714 = vrot.lane.b32.xlu1 %v2168_v56, %s1792_s6 }
  0x77   : > { %731 = vrot.lane.b32.xlu0 %v1410_v45, %s1789_s21 }
  0x78   : > { %733 = vrot.lane.b32.xlu1 %v2152_v38, %s1789_s21 }
  0x7b   : > { %750 = vrot.lane.b32.xlu0 %v2278_v23, %s1788_s20 }
  0x7c   : > { %752 = vrot.lane.b32.xlu1 %v2292_v58, %s1788_s20 }
  0x7f   : > { %769 = vrot.lane.b32.xlu0 %v2168_v56, %s1793_s7 }
  0x80   : > { %771 = vrot.lane.b32.xlu1 %v2200_v16, %s1793_s7 }
  0x83   : > { %788 = vrot.lane.b32.xlu0 %v2152_v38, %s1794_s8 }
  0x84   : > { %638 = vrot.lane.b32.xlu1 %v2168_v56, %s1791_s27 }
  0x87   : > { %790 = vrot.lane.b32.xlu0 %v2188_v52, %s1794_s8 }
  0x88   : > { %640 = vrot.lane.b32.xlu1 %v2200_v16, %s1791_s27 }
  0x8b   : > { %678 = vrot.lane.b32.xlu0 %v2152_v38, %s1790_s24 }
  0x8c   : > { %680 = vrot.lane.b32.xlu1 %v2188_v52, %s1790_s24  ;;  %s1448_s24 = sshll.u32 %s1769_s15, 4 }
  0x8d   : > { %s1238_s29 = sadd.s32 %s1449_s28, %s1448_s24 }
  0x8e   : > { %s1450_s5 = sshll.u32 %s1238_s29, 6 }
  0x8f   : > { %697 = vrot.lane.b32.xlu0 %v2292_v58, %s1787_s11 }
  0x90   : > { %699 = vrot.lane.b32.xlu1 %v1413_v36, %s1787_s11  ;;  %s2420_s11 = sand.u32 1, %s1761_s13  }
  0x91   : > { %s1221_s9 = scalar_lea.sflag [#allocation3], %s2420_s11 }
  0x93   : > { %716 = vrot.lane.b32.xlu0 %v2200_v16, %s1792_s6 }
  0x94   : > { %718 = vrot.lane.b32.xlu1 %v2231_v18, %s1792_s6 }
  0x95   : > { %v688_v40 = vpop.permute.xlu1 %687 }
  0x96   : > { %v686_v47 = vpop.permute.xlu0 %685 }
  0x97   : > { %735 = vrot.lane.b32.xlu0 %v2188_v52, %s1789_s21 }
  0x98   : > { %737 = vrot.lane.b32.xlu1 %v2222_v25, %s1789_s21 }
  0x99   : > { %v745_v53 = vpop.permute.xlu1 %744 }
  0x9a   : > { %v743_v55 = vpop.permute.xlu0 %742 }
  0x9b   : > { %754 = vrot.lane.b32.xlu0 %v1413_v36, %s1788_s20 }
  0x9c   : > { %756 = vrot.lane.b32.xlu1 %v1416_v14, %s1788_s20  ;;  %s1373_s20 = sshll.u32 %s2420_s11, 6 }
  0x9d   : > { %s2423_s21 = scalar_lea.vmem [#allocation2], %s1373_s20  ;;  %s1795_s20 = smov [#allocation2]  }
  0x9e   : > { %v724_v60 = vpop.permute.xlu0 %723  ;;  %s1241_s4 = sshll.u32 %s2423_s21, 4  ;;  %s1663_s24 = sshll.u32 %s1795_s20, 4  ;;  %s2434_s4 = int_to_ptr.vmem [resolvable:$true] %s1241_s4  ;;  %s1664_s24 = int_to_ptr.vmem [resolvable:$false] %s1663_s24 }
  0x9f   : > { %773 = vrot.lane.b32.xlu0 %v2231_v18, %s1793_s7  ;;  %s1659_s10 = scalar_lea.vmem %s2434_s4, 1024  ;;  %s1665_s28 = scalar_lea.vmem %s1664_s24, 2048 }
  0xa0   : > { %775 = vrot.lane.b32.xlu1 %v1417_v51, %s1793_s7  ;;  %v667_v62 = vpop.permute.xlu1 %666  ;;  %p1660_p13 = scmp.ne.s32.totalorder %s2434_s4, %s1659_s10  ;;  %p1666_p2 = scmp.lt.s32.totalorder %s2434_s4, %s1664_s24 }
  0xa1   : > { %p1667_p4 = scmp.lt.s32.totalorder %s1665_s28, %s1659_s10 }
  0xa2   : > { %p1661_p0 = pnand %p1660_p13, %p1869_p3 }
  0xa3   : > { %792 = vrot.lane.b32.xlu0 %v2222_v25, %s1794_s8  ;;  %p1668_p5 = por %p1667_p4, %p1666_p2 }
  0xa4   : > { %794 = vrot.lane.b32.xlu1 %v1418_v61, %s1794_s8  ;;  %v669_v8 = vpop.permute.xlu1 %668  ;;  %s2439_s8 = scalar_lea.hbm %s2531_s2, %s1450_s5  ;;  %p1662_p1 = pneg %p1661_p0 }
  0xa5   : > { %v627_v38 = vpop.permute.xlu0 %626 }
  0xa6   : > { %v799_v20 = vsel %vm796_vm7, %v1389_v9, %v627_v38  ;;  %p1669_p6 = pnand %p1668_p5, %p1662_p1 }
  0xa7   : > { %v823_v52 = vsel %vm821_vm8, %v799_v20, %v667_v62 }
  0xa8   : > { %v726_v54 = vpop.permute.xlu1 %725  ;;  %v840_v57 = vsel %vm838_vm9, %v823_v52, %v686_v47 }
  0xa9   : > { %v629_v56 = vpop.permute.xlu0 %628 }
  0xaa   : > { %v802_v34 = vsel %vm796_vm7, %v1917_v10, %v629_v56 }
  0xab   : > { %v825_v15 = vsel %vm821_vm8, %v802_v34, %v669_v8 }
  0xac   : > { %v842_v16 = vsel %vm838_vm9, %v825_v15, %v688_v40 }
  0xad   : > { %v705_v59 = vpop.permute.xlu0 %704 }
  0xae   : > { %v707_v27 = vpop.permute.xlu1 %706  ;;  %v857_v29 = vsel %vm855_vm10, %v840_v57, %v705_v59 }
  0xaf   : > { %v874_v12 = vsel %vm872_vm11, %v857_v29, %v724_v60  ;;  %v859_v37 = vsel %vm855_vm10, %v842_v16, %v707_v27 }
  0xb0   : > { %v891_v2 = vsel %vm889_vm12, %v874_v12, %v743_v55  ;;  %v876_v13 = vsel %vm872_vm11, %v859_v37, %v726_v54 }
  0xb1   : > { %v762_v63 = vpop.permute.xlu0 %761  ;;  %v893_v5 = vsel %vm889_vm12, %v876_v13, %v745_v53 }
  0xb2   : > { %v764_v10 = vpop.permute.xlu1 %763  ;;  %v908_v19 = vsel %vm906_vm13, %v891_v2, %v762_v63 }
  0xb3   : > { %v910_v48 = vsel %vm906_vm13, %v893_v5, %v764_v10 }
  0xb5   : > { %v781_v7 = vpop.permute.xlu0 %780 }
  0xb6   : > { %v631_v25 = vpop.permute.xlu1 %630  ;;  %v925_v44 = vsel %vm923_vm14, %v908_v19, %v781_v7 }
  0xb7   : > { %1536 = vmatprep.mubr.msk.bf16.mxu0 %vm960_vm15, %v925_v44  ;;  %v805_v3 = vsel %vm796_vm7, %v1907_v4, %v631_v25 }
  0xb9   : > { %v783_v11 = vpop.permute.xlu0 %782 }
  0xba   : > { %v633_v22 = vpop.permute.xlu1 %632  ;;  %v927_v26 = vsel %vm923_vm14, %v910_v48, %v783_v11 }
  0xbb   : > { %1537 = vmatmul.mubr.msk.bf16.vlgmr.msra.gmra.mrb[0].mxu0 %vm960_vm15, %v927_v26  ;;  %v808_v50 = vsel %vm796_vm7, %v1936_v21, %v633_v22 }
  0xbd   : > { %v671_v28 = vpop.permute.xlu0 %670 }
  0xbe   : > { %v673_v18 = vpop.permute.xlu1 %672  ;;  %v827_v39 = vsel %vm821_vm8, %v805_v3, %v671_v28 }
  0xbf   : > { %v829_v61 = vsel %vm821_vm8, %v808_v50, %v673_v18 }
  0xc1   : > { %v690_v0 = vpop.permute.xlu0 %689 }
  0xc2   : > { %v692_v6 = vpop.permute.xlu1 %691  ;;  %v844_v41 = vsel %vm838_vm9, %v827_v39, %v690_v0 }
  0xc3   : > { %v846_v31 = vsel %vm838_vm9, %v829_v61, %v692_v6 }
  0xc5   : > { %v709_v30 = vpop.permute.xlu0 %708 }
  0xc6   : > { %v711_v32 = vpop.permute.xlu1 %710  ;;  %v861_v46 = vsel %vm855_vm10, %v844_v41, %v709_v30 }
  0xc7   : > { %v863_v36 = vsel %vm855_vm10, %v846_v31, %v711_v32 }
  0xc9   : > { %v728_v33 = vpop.permute.xlu0 %727 }
  0xca   : > { %v730_v9 = vpop.permute.xlu1 %729  ;;  %v878_v17 = vsel %vm872_vm11, %v861_v46, %v728_v33 }
  0xcb   : > { %v880_v14 = vsel %vm872_vm11, %v863_v36, %v730_v9 }
  0xcd   : > { %v747_v35 = vpop.permute.xlu0 %746 }
  0xce   : > { %v749_v24 = vpop.permute.xlu1 %748  ;;  %v895_v51 = vsel %vm889_vm12, %v878_v17, %v747_v35 }
  0xcf   : > { %v897_v21 = vsel %vm889_vm12, %v880_v14, %v749_v24 }
  0xd1   : > { %v766_v43 = vpop.permute.xlu0 %765 }
  0xd2   : > { %v768_v49 = vpop.permute.xlu1 %767  ;;  %v912_v4 = vsel %vm906_vm13, %v895_v51, %v766_v43 }
  0xd3   : > { %v914_v53 = vsel %vm906_vm13, %v897_v21, %v768_v49 }
  0xd5   : > { %v785_v45 = vpop.permute.xlu0 %784 }
  0xd6   : > { %v635_v40 = vpop.permute.xlu1 %634  ;;  %v929_v47 = vsel %vm923_vm14, %v912_v4, %v785_v45 }
  0xd7   : > { %1540 = vmatprep.mubr.msk.bf16.mxu0 %vm960_vm15, %v929_v47  ;;  %v811_v59 = vsel %vm796_vm7, %v2072_v1, %v635_v40 }
  0xd9   : > { %v787_v55 = vpop.permute.xlu0 %786 }
  0xda   : > { %v637_v60 = vpop.permute.xlu1 %636  ;;  %v931_v62 = vsel %vm923_vm14, %v914_v53, %v787_v55 }
  0xdb   : > { %1541 = vmatmul.mubr.msk.bf16.gmra.mrb[4].mxu0 %vm960_vm15, %v931_v62  ;;  %v814_v10 = vsel %vm796_vm7, %v2093_v42, %v637_v60 }
  0xdd   : > { %v675_v8 = vpop.permute.xlu0 %674 }
  0xde   : > { %v677_v38 = vpop.permute.xlu1 %676  ;;  %v831_v27 = vsel %vm821_vm8, %v811_v59, %v675_v8 }
  0xdf   : > { %v833_v13 = vsel %vm821_vm8, %v814_v10, %v677_v38 }
  0xe1   : > { %v694_v20 = vpop.permute.xlu0 %693 }
  0xe2   : > { %v696_v54 = vpop.permute.xlu1 %695  ;;  %v848_v29 = vsel %vm838_vm9, %v831_v27, %v694_v20 }
  0xe3   : > { %v850_v7 = vsel %vm838_vm9, %v833_v13, %v696_v54 }
  0xe5   : > { %v713_v56 = vpop.permute.xlu0 %712 }
  0xe6   : > { %v715_v52 = vpop.permute.xlu1 %714  ;;  %v865_v37 = vsel %vm855_vm10, %v848_v29, %v713_v56 }
  0xe7   : > { %v867_v25 = vsel %vm855_vm10, %v850_v7, %v715_v52 }
  0xe9   : > { %v732_v34 = vpop.permute.xlu0 %731 }
  0xea   : > { %v734_v15 = vpop.permute.xlu1 %733  ;;  %v882_v2 = vsel %vm872_vm11, %v865_v37, %v732_v34 }
  0xeb   : > { %v884_v11 = vsel %vm872_vm11, %v867_v25, %v734_v15 }
  0xed   : > { %v751_v16 = vpop.permute.xlu0 %750 }
  0xee   : > { %v753_v57 = vpop.permute.xlu1 %752  ;;  %v899_v19 = vsel %vm889_vm12, %v882_v2, %v751_v16 }
  0xef   : > { %v901_v42 = vsel %vm889_vm12, %v884_v11, %v753_v57 }
  0xf1   : > { %v770_v12 = vpop.permute.xlu0 %769 }
  0xf2   : > { %v772_v63 = vpop.permute.xlu1 %771  ;;  %v916_v1 = vsel %vm906_vm13, %v899_v19, %v770_v12 }
  0xf3   : > { %v918_v22 = vsel %vm906_vm13, %v901_v42, %v772_v63 }
  0xf5   : > { %v789_v5 = vpop.permute.xlu0 %788 }
  0xf6   : > { %v639_v44 = vpop.permute.xlu1 %638  ;;  %v933_v48 = vsel %vm923_vm14, %v916_v1, %v789_v5 }
  0xf7   : > { %1544 = vmatprep.mubr.msk.bf16.mxu1 %vm960_vm15, %v933_v48  ;;  %v817_v41 = vsel %vm796_vm7, %v2278_v23, %v639_v44 }
  0xf9   : > { %v791_v26 = vpop.permute.xlu0 %790 }
  0xfa   : > { %v641_v28 = vpop.permute.xlu1 %640  ;;  %v935_v18 = vsel %vm923_vm14, %v918_v22, %v791_v26 }
  0xfb   : > { %1545 = vmatmul.mubr.msk.bf16.vlgmr.msra.gmra.mrb[0].mxu1 %vm960_vm15, %v935_v18  ;;  %v820_v43 = vsel %vm796_vm7, %v2292_v58, %v641_v28 }
  0xfd   : > { %v679_v0 = vpop.permute.xlu0 %678 }
  0xfe   : > { %v681_v6 = vpop.permute.xlu1 %680  ;;  %v835_v46 = vsel %vm821_vm8, %v817_v41, %v679_v0 }
  0xff   : > { %v837_v49 = vsel %vm821_vm8, %v820_v43, %v681_v6 }
 0x101   : > { %v698_v30 = vpop.permute.xlu0 %697 }
 0x102   : > { %v700_v32 = vpop.permute.xlu1 %699  ;;  %v852_v50 = vsel %vm838_vm9, %v835_v46, %v698_v30 }
 0x103   : > { %v854_v61 = vsel %vm838_vm9, %v837_v49, %v700_v32 }
 0x105   : > { %v717_v33 = vpop.permute.xlu0 %716 }
 0x106   : > { %v719_v9 = vpop.permute.xlu1 %718  ;;  %v869_v51 = vsel %vm855_vm10, %v852_v50, %v717_v33 }
 0x107   : > { %v871_v4 = vsel %vm855_vm10, %v854_v61, %v719_v9 }
 0x109   : > { %v736_v35 = vpop.permute.xlu0 %735 }
 0x10a   : > { %v738_v24 = vpop.permute.xlu1 %737  ;;  %v886_v23 = vsel %vm872_vm11, %v869_v51, %v736_v35 }
 0x10b   : > { %v888_v45 = vsel %vm872_vm11, %v871_v4, %v738_v24 }
 0x10d   : > { %v755_v3 = vpop.permute.xlu0 %754 }
 0x10e   : > { %v757_v39 = vpop.permute.xlu1 %756  ;;  %v903_v58 = vsel %vm889_vm12, %v886_v23, %v755_v3 }
 0x10f   : > { %v905_v36 = vsel %vm889_vm12, %v888_v45, %v757_v39 }
 0x111   : > { %v774_v17 = vpop.permute.xlu0 %773 }
 0x112   : > { %v776_v31 = vpop.permute.xlu1 %775  ;;  %v920_v40 = vsel %vm906_vm13, %v903_v58, %v774_v17 }
 0x113   : > { %v922_v14 = vsel %vm906_vm13, %v905_v36, %v776_v31 }
 0x115   : > { %v793_v47 = vpop.permute.xlu0 %792 }
 0x116   : > { %v795_v21 = vpop.permute.xlu1 %794  ;;  %v937_v53 = vsel %vm923_vm14, %v920_v40, %v793_v47 }
 0x117   : > { %v939_v55 = vsel %vm923_vm14, %v922_v14, %v795_v21  ;;  %1548 = vmatprep.mubr.msk.bf16.mxu1 %vm960_vm15, %v937_v53 }
 0x118   : > { %1549 = vmatmul.mubr.msk.bf16.gmra.mrb[4].mxu1 %vm960_vm15, %v939_v55 }
 0x18e   : > { %v1538_v60 = vpop.f32.mrb[0].mxu0 }
 0x18f   : > { %v1015_v62 = vpop.f32.mrb[1].mxu0  ;;  %v1181_v15 = vmul.f32 %v1538_v60, %v1538_v60 }
 0x190   : > { %v1539_v8 = vpop.f32.mrb[2].mxu0  ;;  %v1179_v54 = vmul.f32 %v1015_v62, %v1015_v62 }
 0x191   : > { %v1480_v38 = vpack.c.bf16 %v1539_v8, %v1538_v60  ;;  %v1018_v20 = vpop.f32.mrb[3].mxu0  ;;  %v1182_v59 = vmul.f32 %v1539_v8, %v1539_v8 }
 0x192   : > { %v1475_v56 = vpack.c.bf16 %v1018_v20, %v1015_v62  ;;  %v1158_v52 = vadd.f32 %v1018_v20, %v1015_v62  ;;  %v1180_v34 = vmul.f32 %v1018_v20, %v1018_v20 }
 0x193   : > { %1512 = vst [vmem:[%s2423_s21 + $0x8] sm:$0xff] %v1480_v38  }
 0x194   : > { %1476 = vst [vmem:[%s2423_s21] sm:$0xff] %v1475_v56   ;;  %v1159_v16 = vadd.f32 %v1538_v60, %v1158_v52  ;;  %v1195_v57 = vadd.f32 %v1180_v34, %v1179_v54 }
 0x196   : > { %v1196_v27 = vadd.f32 %v1195_v57, %v1181_v15  ;;  %v1160_v29 = vadd.f32 %v1539_v8, %v1159_v16 }
 0x198   : > { %v1197_v12 = vadd.f32 %v1196_v27, %v1182_v59 }
 0x1ae   : > { %v1542_v37 = vpop.f32.mrb[4].mxu0 }
 0x1af   : > { %v1031_v63 = vpop.f32.mrb[5].mxu0  ;;  %v1185_v48 = vmul.f32 %v1542_v37, %v1542_v37 }
 0x1b0   : > { %v1161_v10 = vadd.f32 %v1160_v29, %v1031_v63  ;;  %v1183_v2 = vmul.f32 %v1031_v63, %v1031_v63  ;;  %v1543_v13 = vpop.f32.mrb[6].mxu0 }
 0x1b1   : > { %v1490_v19 = vpack.c.bf16 %v1543_v13, %v1542_v37  ;;  %v1034_v7 = vpop.f32.mrb[7].mxu0  ;;  %v1186_v22 = vmul.f32 %v1543_v13, %v1543_v13 }
 0x1b2   : > { %v1198_v1 = vadd.f32 %v1197_v12, %v1183_v2  ;;  %v1485_v5 = vpack.c.bf16 %v1034_v7, %v1031_v63  ;;  %v1162_v25 = vadd.f32 %v1161_v10, %v1034_v7  ;;  %v1184_v44 = vmul.f32 %v1034_v7, %v1034_v7 }
 0x1b3   : > { %1514 = vst [vmem:[%s2423_s21 + $0x18] sm:$0xff] %v1490_v19  }
 0x1b4   : > { %1513 = vst [vmem:[%s2423_s21 + $0x10] sm:$0xff] %v1485_v5   ;;  %v1163_v11 = vadd.f32 %v1542_v37, %v1162_v25  ;;  %v1199_v42 = vadd.f32 %v1198_v1, %v1184_v44 }
 0x1b6   : > { %v1200_v26 = vadd.f32 %v1199_v42, %v1185_v48  ;;  %v1164_v28 = vadd.f32 %v1543_v13, %v1163_v11 }
 0x1b8   : > { %v1201_v18 = vadd.f32 %v1200_v26, %v1186_v22 }
 0x1ce   : > { %v1546_v0 = vpop.f32.mrb[0].mxu1 }
 0x1cf   : > { %v1047_v6 = vpop.f32.mrb[1].mxu1  ;;  %v1189_v43 = vmul.f32 %v1546_v0, %v1546_v0 }
 0x1d0   : > { %v1165_v30 = vadd.f32 %v1164_v28, %v1047_v6  ;;  %v1187_v32 = vmul.f32 %v1047_v6, %v1047_v6  ;;  %v1547_v33 = vpop.f32.mrb[2].mxu1 }
 0x1d1   : > { %v1500_v9 = vpack.c.bf16 %v1547_v33, %v1546_v0  ;;  %v1050_v35 = vpop.f32.mrb[3].mxu1  ;;  %v1190_v50 = vmul.f32 %v1547_v33, %v1547_v33 }
 0x1d2   : > { %v1202_v24 = vadd.f32 %v1201_v18, %v1187_v32  ;;  %v1495_v3 = vpack.c.bf16 %v1050_v35, %v1047_v6  ;;  %v1166_v39 = vadd.f32 %v1165_v30, %v1050_v35  ;;  %v1188_v41 = vmul.f32 %v1050_v35, %v1050_v35 }
 0x1d3   : > { %1516 = vst [vmem:[%s2423_s21 + $0x28] sm:$0xff] %v1500_v9  }
 0x1d4   : > { %1515 = vst [vmem:[%s2423_s21 + $0x20] sm:$0xff] %v1495_v3   ;;  %v1167_v46 = vadd.f32 %v1546_v0, %v1166_v39  ;;  %v1203_v49 = vadd.f32 %v1202_v24, %v1188_v41 }
 0x1d6   : > { %v1204_v17 = vadd.f32 %v1203_v49, %v1189_v43  ;;  %v1168_v61 = vadd.f32 %v1547_v33, %v1167_v46 }
 0x1d8   : > { %v1205_v51 = vadd.f32 %v1204_v17, %v1190_v50 }
 0x1eb   : > { %v1550_v31 = vpop.f32.mrb[4].mxu1 }
 0x1ec   : > { %v1063_v4 = vpop.f32.mrb[5].mxu1  ;;  %v1193_v55 = vmul.f32 %v1550_v31, %v1550_v31 }
 0x1ed   : > { %v1169_v23 = vadd.f32 %v1168_v61, %v1063_v4  ;;  %v1191_v45 = vmul.f32 %v1063_v4, %v1063_v4  ;;  %v1551_v58 = vpop.f32.mrb[6].mxu1 }
 0x1ee   : > { %v1510_v36 = vpack.c.bf16 %v1551_v58, %v1550_v31  ;;  %v1066_v40 = vpop.f32.mrb[7].mxu1 }
 0x1ef   : > { %v1206_v47 = vadd.f32 %v1205_v51, %v1191_v45  ;;  %v1505_v14 = vpack.c.bf16 %v1066_v40, %v1063_v4  ;;  %v1170_v21 = vadd.f32 %v1169_v23, %v1066_v40  ;;  %v1192_v53 = vmul.f32 %v1066_v40, %v1066_v40 }
 0x1f0   : > { %1518 = vst [vmem:[%s2423_s21 + $0x38] sm:$0xff] %v1510_v36  }
 0x1f1   : > { %1517 = vst [vmem:[%s2423_s21 + $0x30] sm:$0xff] %v1505_v14   ;;  %v1171_v60 = vadd.f32 %v1550_v31, %v1170_v21  ;;  %v1207_v62 = vadd.f32 %v1206_v47, %v1192_v53 }
 0x1f2   : > { %1672 = shalt.err (!%p1669_p6)
}
 0x1f3   : > { %s1673_s21 = scalar_lea.hbm %s2439_s8, 1024  ;;  %s1677_s6 = scalar_lea.hbm %s2531_s2, 4096 }
 0x1f4   : > { %p1674_p7 = scmp.ne.s32.totalorder %s2439_s8, %s1673_s21  ;;  %p1678_p11 = scmp.lt.u32.totalorder %s2439_s8, %s2531_s2 }
 0x1f5   : > { %p1679_p12 = scmp.lt.u32.totalorder %s1677_s6, %s1673_s21  ;;  %p1681_p0 = scmp.lt.u32.totalorder %s1673_s21, %s2439_s8 }
 0x1f6   : > { %p1675_p9 = pnand %p1674_p7, %p1869_p3 }
 0x1f7   : > { %p1680_p13 = por %p1679_p12, %p1678_p11 }
 0x1f8   : > { %p1676_p10 = pneg %p1675_p9 }
 0x1f9   : > { %p1682_p1 = por %p1681_p0, %p1680_p13 }
 0x1fb   : > { %p1683_p2 = pnand %p1682_p1, %p1676_p10 }
 0x1fd   : > { %1686 = shalt.err (!%p1683_p2)
}
 0x1fe   : > { %s1796_s10 = smov 64   ;;  %v1194_v8 = vmul.f32 %v1551_v58, %v1551_v58  ;;  %v1172_v38 = vadd.f32 %v1551_v58, %v1171_v60  ;;  %v1208_v20 = vadd.f32 %v1207_v62, %v1193_v55  ;;  %s1374_s24 = sshll.u32 %s2420_s11, 3  ;;  %vm1216_vm0 = vcmask 1040384  }
 0x1ff   : > { %1561 = dma.vmem_to_hbm [thread:$0]  (%p1869_p3), %s2434_s4, 1024, %s2439_s8, %s1221_s9, %s1796_s10, %s1796_s10, %s1791_s27  }
 0x200   : > { %v1173_v54 = vrot.slane %v1172_v38, 4  ;;  %v1209_v56 = vadd.f32 %v1208_v20, %v1194_v8  ;;  %s1451_s28 = sshll.u32 %s1773_s16, 1  ;;  %s190_s4 = scalar_lea.vmem [#allocation4], %s1374_s24 }
 0x201   : > { %s1255_s21 = sadd.s32 %s1769_s15, %s1451_s28  ;;  %s1259_s8 = sshll.u32 %s190_s4, 4  ;;  %s2476_s8 = int_to_ptr.vmem [resolvable:$true] %s1259_s8 }
 0x202   : > { %v1174_v52 = vadd.f32 %v1173_v54, %v1172_v38  ;;  %v1210_v34 = vrot.slane %v1209_v56, 4  ;;  %s1452_s27 = sshll.u32 %s1255_s21, 7  ;;  %s1226_s15 = scalar_lea.sflag [#allocation5], %s2420_s11 }
 0x203   : > { %s2474_s5 = scalar_lea.hbm %s2532_s3, %s1452_s27  ;;  %s1687_s16 = scalar_lea.vmem %s2476_s8, 128 }
 0x204   : > { %v1175_v15 = vrot.slane %v1174_v52, 2  ;;  %v1211_v16 = vadd.f32 %v1210_v34, %v1209_v56  ;;  %p1688_p4 = scmp.ne.s32.totalorder %s2476_s8, %s1687_s16  ;;  %s1797_s6 = smov [#allocation4]  }
 0x205   : > { %s1691_s7 = sshll.u32 %s1797_s6, 4  ;;  %s1692_s7 = int_to_ptr.vmem [resolvable:$false] %s1691_s7 }
 0x206   : > { %v1176_v57 = vadd.f32 %v1175_v15, %v1174_v52  ;;  %v1212_v59 = vrot.slane %v1211_v16, 2  ;;  %p1689_p5 = pnand %p1688_p4, %p1869_p3  ;;  %s1693_s20 = scalar_lea.vmem %s1692_s7, 256 }
 0x207   : > { %p1694_p7 = scmp.lt.s32.totalorder %s2476_s8, %s1692_s7  ;;  %p1695_p9 = scmp.lt.s32.totalorder %s1693_s20, %s1687_s16 }
 0x208   : > { %v1177_v27 = vrot.slane %v1176_v57, 1  ;;  %v1213_v29 = vadd.f32 %v1212_v59, %v1211_v16  ;;  %p1690_p6 = pneg %p1689_p5 }
 0x209   : > { %p1696_p10 = por %p1695_p9, %p1694_p7 }
 0x20a   : > { %v1214_v12 = vrot.slane %v1213_v29, 1  ;;  %v1178_v37 = vadd.f32 %v1177_v27, %v1176_v57 }
 0x20b   : > { %p1697_p11 = pnand %p1696_p10, %p1690_p6 }
 0x20c   : > { %v1215_v63 = vadd.f32 %v1214_v12, %v1213_v29 }
 0x20e   : > { %v1217_v10 = vsel %vm1216_vm0, %v1178_v37, %v1215_v63 }
 0x20f   : > { %v1218_v2 = vsel %vm977_vm6, %v1217_v10, 0.0 }
 0x210   : > { %1219 = vst [vmem:[%s190_s4] sm:$0xff] %v1218_v2 }
 0x211   : > { %1700 = shalt.err (!%p1697_p11)
}
 0x212   : > { %s1701_s11 = scalar_lea.hbm %s2474_s5, 128  ;;  %s1705_s28 = scalar_lea.hbm %s2532_s3, 512 }
 0x213   : > { %p1702_p12 = scmp.ne.s32.totalorder %s2474_s5, %s1701_s11  ;;  %p1706_p1 = scmp.lt.u32.totalorder %s2474_s5, %s2532_s3 }
 0x214   : > { %p1707_p2 = scmp.lt.u32.totalorder %s1705_s28, %s1701_s11  ;;  %p1709_p5 = scmp.lt.u32.totalorder %s1701_s11, %s2474_s5 }
 0x215   : > { %p1703_p13 = pnand %p1702_p12, %p1869_p3 }
 0x216   : > { %p1708_p4 = por %p1707_p2, %p1706_p1 }
 0x217   : > { %p1704_p0 = pneg %p1703_p13 }
 0x218   : > { %p1710_p6 = por %p1709_p5, %p1708_p4 }
 0x21a   : > { %p1711_p7 = pnand %p1710_p6, %p1704_p0 }
 0x21c   : > { %1714 = shalt.err (!%p1711_p7)
}
 0x21d   : > { %1562 = dma.vmem_to_hbm [thread:$0]  (%p1869_p3), %s2476_s8, 128, %s2474_s5, %s1226_s15  }
 0x21e PF: > { %p1572_p9 = scmp.ge.s32.totalorder %s1785_s19, 2  ;;  %s1271_s4 = sand.u32 1, %s1757_s12  }
 0x21f   : > { %s1272_s9 = scalar_lea.sflag [#allocation3], %s1271_s4 }
 0x220   : > { %p1566_p10 = pnand %p1572_p9, %p1878_p8 }
 0x222   : > { %1748 = dma.done.wait (!%p1566_p10), %s1272_s9, 1024  }
 0x223   : > { %1750 = vsyncadd (!%p1566_p10), %s1272_s9, 4294966272  ;;  %s1281_s29 = scalar_lea.sflag [#allocation5], %s1271_s4 }
 0x224   : > { %1752 = dma.done.wait (!%p1566_p10), %s1281_s29, 128  }
 0x225   : > { %1754 = vsyncadd (!%p1566_p10), %s1281_s29, 4294967168  ;;  %s20_s19 = sadd.s32 1, %s1785_s19   ;;  %s2539_s12 = smov %s1761_s13 }
 0x226   : > { %p17_p11 = scmp.ge.s32.totalorder %s20_s19, 6   ;;  %s2540_s13 = smov %s1765_s14 }
 0x227   : > { %s2541_s14 = smov %s1887_s30  ;;  %s2542_s15 = smov %s1777_s17 }
 0x228   : > { %s2543_s16 = smov %s1781_s18  ;;  %s2544_s17 = smov %s2547_s22 }
 0x229   : > { %s2545_s18 = smov %s2551_s23  ;;  %19 = sbr.rel (!%p17_p11) target bundleno = 7 (0x7), region = 81 }
 0x230   :  { %1286 = vsyncpa [#allocation3], 1 }
 0x231   :  { %1288 = vsyncpa [#allocation3 + $0x1], 1 }
 0x232   :  { %1289 = vsyncpa [#allocation5], 1 }
 0x233   :  { %1291 = vsyncpa [#allocation5 + $0x1], 1 }

</bundles_post_ra>
